<compile_context>
chip_gen: v6e
topology: v6e:2x2x1
jax: 0.10.0
libtpu: 0.0.40
codegen_flags: <defaults>
</compile_context>

<pallas_src>
import jax
import jax.numpy as jnp
from jax.experimental import pallas as pl
from jax.experimental.pallas import tpu as pltpu

LANE = 128


def _round_up(x, m):
    return (x + m - 1) // m * m


def _actor_kernel(x_ref, w1_ref, b1_ref, w2_ref, b2_ref, w3_ref, b3_ref, o_ref):
    # One (agent, batch-tile) step of the fused actor MLP.
    # bf16 matmul operands on the MXU, f32 accumulation, f32 elementwise epilogue.
    x = x_ref[...].astype(w1_ref.dtype)
    h1 = jnp.dot(x, w1_ref[...], preferred_element_type=jnp.float32) + b1_ref[...]
    h1 = jnp.maximum(h1, 0.0)
    h2 = jnp.dot(h1.astype(w2_ref.dtype), w2_ref[...],
                 preferred_element_type=jnp.float32) + b2_ref[...]
    h2 = jnp.maximum(h2, 0.0)
    h3 = jnp.dot(h2.astype(w3_ref.dtype), w3_ref[...],
                 preferred_element_type=jnp.float32) + b3_ref[...]
    o_ref[...] = jnp.tanh(h3).astype(o_ref.dtype)


def maddpg_actor_forward(obs, packed, *, tile_b=512):
    """Fused MADDPG actor forward for ALL agents in a single pallas_call.

    obs:    [n_agents, batch, obs_dim] float32
    packed: output of pack_actor_params(); lane-padded bf16 weights, f32 biases.
    returns [n_agents, batch, action_dim] float32 in (-1, 1)
    """
    n_agents, batch, obs_dim = obs.shape
    action_dim = packed["action_dim"]
    h_pad = packed["w1"].shape[-1]
    a_pad = packed["w3"].shape[-1]

    # Pad batch to an 8-aligned tile multiple; weights stay resident across tiles.
    b_pad = _round_up(max(batch, 8), 8)
    tb = min(tile_b, b_pad)
    b_pad = _round_up(b_pad, tb)
    if b_pad != batch:
        obs = jnp.pad(obs, ((0, 0), (0, b_pad - batch), (0, 0)))
    n_bt = b_pad // tb

    # Weights / biases: constant index over the inner batch-tile axis
    # -> VMEM-resident for the whole agent (no re-DMA per batch tile).
    def w_spec(arr):
        return pl.BlockSpec((None,) + arr.shape[1:], lambda a, b: (a, 0, 0))

    flops = 2 * n_agents * b_pad * (obs_dim * h_pad + h_pad * h_pad + h_pad * a_pad)
    bytes_accessed = (
        obs.size * obs.dtype.itemsize
        + sum(packed[k].size * packed[k].dtype.itemsize
              for k in ("w1", "b1", "w2", "b2", "w3", "b3"))
        + n_agents * b_pad * a_pad * 4)
    cost = pl.CostEstimate(flops=flops,
                           transcendentals=n_agents * b_pad * a_pad,
                           bytes_accessed=bytes_accessed)

    out = pl.pallas_call(
        _actor_kernel,
        out_shape=jax.ShapeDtypeStruct((n_agents, b_pad, a_pad), jnp.float32),
        grid=(n_agents, n_bt),
        in_specs=[
            pl.BlockSpec((None, tb, obs_dim), lambda a, b: (a, b, 0)),
            w_spec(packed["w1"]), w_spec(packed["b1"]),
            w_spec(packed["w2"]), w_spec(packed["b2"]),
            w_spec(packed["w3"]), w_spec(packed["b3"]),
        ],
        out_specs=pl.BlockSpec((None, tb, a_pad), lambda a, b: (a, b, 0)),
        compiler_params=pltpu.CompilerParams(
            dimension_semantics=("parallel", "parallel"),
            vmem_limit_bytes=32 << 20),
        cost_estimate=cost,
    )(obs, packed["w1"], packed["b1"], packed["w2"], packed["b2"],
      packed["w3"], packed["b3"])

    return out[:, :batch, :action_dim]


def init_stacked_actor_params(key, n_agents, obs_dim, action_dim, hidden_dim):
    """torch.nn.Linear-style init U(-1/sqrt(fan_in), 1/sqrt(fan_in)), per agent,
    stacked on a leading agent axis. Weights stored [in_dim, out_dim]."""
    def linear(kw, kb, fan_in, fan_out):
        bound = 1.0 / jnp.sqrt(jnp.float32(fan_in))
        w = jax.random.uniform(kw, (fan_in, fan_out), jnp.float32, -bound, bound)
        b = jax.random.uniform(kb, (fan_out,), jnp.float32, -bound, bound)
        return w, b

    names = ("w1", "b1", "w2", "b2", "w3", "b3")
    params = {k: [] for k in names}
    keys = jax.random.split(key, n_agents * 6).reshape(n_agents, 6, -1)
    for a in range(n_agents):
        k = keys[a]
        w1, b1 = linear(k[0], k[1], obs_dim, hidden_dim)
        w2, b2 = linear(k[2], k[3], hidden_dim, hidden_dim)
        w3, b3 = linear(k[4], k[5], hidden_dim, action_dim)
        for name, v in zip(names, (w1, b1, w2, b2, w3, b3)):
            params[name].append(v)
    return {k: jnp.stack(v) for k, v in params.items()}


def pack_actor_params(raw, lane=LANE, weight_dtype=jnp.bfloat16):
    """Lane-pad hidden/action dims to a multiple of 128 (unmasked full-lane stores)
    and cast matmul weights to bf16 (kernel accumulates in f32). Zero padding is
    exact: padded hidden/action columns are 0 through ReLU and tanh."""
    hidden = raw["w1"].shape[-1]
    action_dim = raw["w3"].shape[-1]
    h_pad = _round_up(hidden, lane)
    a_pad = _round_up(action_dim, lane)

    def pad_w(w, out_pad, in_pad=None):
        _, i, o = w.shape
        ip = i if in_pad is None else in_pad
        return jnp.pad(w, ((0, 0), (0, ip - i), (0, out_pad - o)))

    def pad_b(b, out_pad):
        _, o = b.shape
        return jnp.pad(b, ((0, 0), (0, out_pad - o)))[:, None, :]  # [n, 1, out_pad]

    return {
        "w1": pad_w(raw["w1"], h_pad).astype(weight_dtype),
        "b1": pad_b(raw["b1"], h_pad).astype(jnp.float32),
        "w2": pad_w(raw["w2"], h_pad, in_pad=h_pad).astype(weight_dtype),
        "b2": pad_b(raw["b2"], h_pad).astype(jnp.float32),
        "w3": pad_w(raw["w3"], a_pad, in_pad=h_pad).astype(weight_dtype),
        "b3": pad_b(raw["b3"], a_pad).astype(jnp.float32),
        "action_dim": action_dim,
    }


def _reference_forward(obs, raw):
    """Pure-JAX reference mirroring the kernel's numerics (bf16 operands, f32 acc)."""
    def lin(x, w, b):
        return jnp.dot(x.astype(jnp.bfloat16), w.astype(jnp.bfloat16),
                       preferred_element_type=jnp.float32) + b

    def per_agent(o, w1, b1, w2, b2, w3, b3):
        h1 = jnp.maximum(lin(o, w1, b1), 0.0)
        h2 = jnp.maximum(lin(h1, w2, b2), 0.0)
        return jnp.tanh(lin(h2, w3, b3))

    return jax.vmap(per_agent)(obs, raw["w1"], raw["b1"], raw["w2"], raw["b2"],
                               raw["w3"], raw["b3"])


if __name__ == "__main__":
    # Small shapes consistent with the module: per-agent obs_dim=16, action_dim=4,
    # config.hidden_dim=32, num_agents=3, batch=8.
    n_agents, obs_dim, action_dim, hidden_dim, batch = 3, 16, 4, 32, 8

    key = jax.random.PRNGKey(0)
    k_obs, k_params = jax.random.split(key)
    obs = jax.random.normal(k_obs, (n_agents, batch, obs_dim), jnp.float32)
    raw = init_stacked_actor_params(k_params, n_agents, obs_dim, action_dim, hidden_dim)
    packed = pack_actor_params(raw)

    out = maddpg_actor_forward(obs, packed)
    out = jax.block_until_ready(out)

    ref = _reference_forward(obs, raw)
    assert out.shape == (n_agents, batch, action_dim)
    assert jnp.allclose(out, ref, atol=1e-4, rtol=1e-4), "mismatch vs. reference"

    # TODO(synk): update_critic/update_actor, soft/hard target updates, Adam,
    # exploration noise in act(), and save/load are training/optimizer logic,
    # not part of forward(); not implemented as kernels.
    print("KERNEL_OK")
</pallas_src>

<mosaic_0001>
module attributes {stable_mosaic.version = 11 : i64} {
  func.func @_actor_kernel(%arg0: i32, %arg1: i32, %arg2: memref<1x8x16xf32, #tpu.memory_space<vmem>>, %arg3: memref<1x16x128xbf16, #tpu.memory_space<vmem>>, %arg4: memref<1x1x128xf32, #tpu.memory_space<vmem>>, %arg5: memref<1x128x128xbf16, #tpu.memory_space<vmem>>, %arg6: memref<1x1x128xf32, #tpu.memory_space<vmem>>, %arg7: memref<1x128x128xbf16, #tpu.memory_space<vmem>>, %arg8: memref<1x1x128xf32, #tpu.memory_space<vmem>>, %arg9: memref<1x8x128xf32, #tpu.memory_space<vmem>>) attributes {dimension_semantics = [#tpu.dimension_semantics<parallel>, #tpu.dimension_semantics<parallel>], iteration_bounds = array<i64: 3, 1>, scalar_prefetch = 0 : i64, scratch_operands = 0 : i64, tpu.core_type = #tpu.core_type<tc>, window_params = [{transform_indices = @transform_0, window_bounds = array<i64: 1, 8, 16>}, {transform_indices = @transform_1, window_bounds = array<i64: 1, 16, 128>}, {transform_indices = @transform_2, window_bounds = array<i64: 1, 1, 128>}, {transform_indices = @transform_3, window_bounds = array<i64: 1, 128, 128>}, {transform_indices = @transform_4, window_bounds = array<i64: 1, 1, 128>}, {transform_indices = @transform_5, window_bounds = array<i64: 1, 128, 128>}, {transform_indices = @transform_6, window_bounds = array<i64: 1, 1, 128>}, {transform_indices = @transform_7, window_bounds = array<i64: 1, 8, 128>}]} {
    %c0 = arith.constant 0 : index
    %c0_0 = arith.constant 0 : index
    %c0_1 = arith.constant 0 : index
    %0 = vector.load %arg2[%c0, %c0_0, %c0_1] : memref<1x8x16xf32, #tpu.memory_space<vmem>>, vector<1x8x16xf32>
    %1 = vector.shape_cast %0 : vector<1x8x16xf32> to vector<8x16xf32>
    %2 = arith.truncf %1 : vector<8x16xf32> to vector<8x16xbf16>
    %c0_2 = arith.constant 0 : index
    %c0_3 = arith.constant 0 : index
    %c0_4 = arith.constant 0 : index
    %3 = vector.load %arg3[%c0_2, %c0_3, %c0_4] : memref<1x16x128xbf16, #tpu.memory_space<vmem>>, vector<1x16x128xbf16>
    %4 = vector.shape_cast %3 : vector<1x16x128xbf16> to vector<16x128xbf16>
    %cst = arith.constant dense<0.000000e+00> : vector<8x128xf32>
    %5 = tpu.matmul %2, %4, %cst {dimension_numbers = #tpu.dot_dimension_numbers<[1], [0], [0], [1], [0, 0, 1, 1], [], []>} : vector<8x16xbf16>, vector<16x128xbf16>, vector<8x128xf32> -> vector<8x128xf32>
    %c0_5 = arith.constant 0 : index
    %c0_6 = arith.constant 0 : index
    %c0_7 = arith.constant 0 : index
    %6 = vector.load %arg4[%c0_5, %c0_6, %c0_7] : memref<1x1x128xf32, #tpu.memory_space<vmem>>, vector<1x1x128xf32>
    %7 = vector.shape_cast %6 : vector<1x1x128xf32> to vector<1x128xf32>
    %8 = vector.broadcast %7 : vector<1x128xf32> to vector<8x128xf32>
    %9 = arith.addf %5, %8 : vector<8x128xf32>
    %cst_8 = arith.constant 0.000000e+00 : f32
    %10 = vector.broadcast %cst_8 : f32 to vector<8x128xf32>
    %11 = arith.maximumf %9, %10 : vector<8x128xf32>
    %12 = arith.truncf %11 : vector<8x128xf32> to vector<8x128xbf16>
    %c0_9 = arith.constant 0 : index
    %c0_10 = arith.constant 0 : index
    %c0_11 = arith.constant 0 : index
    %13 = vector.load %arg5[%c0_9, %c0_10, %c0_11] : memref<1x128x128xbf16, #tpu.memory_space<vmem>>, vector<1x128x128xbf16>
    %14 = vector.shape_cast %13 : vector<1x128x128xbf16> to vector<128x128xbf16>
    %cst_12 = arith.constant dense<0.000000e+00> : vector<8x128xf32>
    %15 = tpu.matmul %12, %14, %cst_12 {dimension_numbers = #tpu.dot_dimension_numbers<[1], [0], [0], [1], [0, 0, 1, 1], [], []>} : vector<8x128xbf16>, vector<128x128xbf16>, vector<8x128xf32> -> vector<8x128xf32>
    %c0_13 = arith.constant 0 : index
    %c0_14 = arith.constant 0 : index
    %c0_15 = arith.constant 0 : index
    %16 = vector.load %arg6[%c0_13, %c0_14, %c0_15] : memref<1x1x128xf32, #tpu.memory_space<vmem>>, vector<1x1x128xf32>
    %17 = vector.shape_cast %16 : vector<1x1x128xf32> to vector<1x128xf32>
    %18 = vector.broadcast %17 : vector<1x128xf32> to vector<8x128xf32>
    %19 = arith.addf %15, %18 : vector<8x128xf32>
    %cst_16 = arith.constant 0.000000e+00 : f32
    %20 = vector.broadcast %cst_16 : f32 to vector<8x128xf32>
    %21 = arith.maximumf %19, %20 : vector<8x128xf32>
    %22 = arith.truncf %21 : vector<8x128xf32> to vector<8x128xbf16>
    %c0_17 = arith.constant 0 : index
    %c0_18 = arith.constant 0 : index
    %c0_19 = arith.constant 0 : index
    %23 = vector.load %arg7[%c0_17, %c0_18, %c0_19] : memref<1x128x128xbf16, #tpu.memory_space<vmem>>, vector<1x128x128xbf16>
    %24 = vector.shape_cast %23 : vector<1x128x128xbf16> to vector<128x128xbf16>
    %cst_20 = arith.constant dense<0.000000e+00> : vector<8x128xf32>
    %25 = tpu.matmul %22, %24, %cst_20 {dimension_numbers = #tpu.dot_dimension_numbers<[1], [0], [0], [1], [0, 0, 1, 1], [], []>} : vector<8x128xbf16>, vector<128x128xbf16>, vector<8x128xf32> -> vector<8x128xf32>
    %c0_21 = arith.constant 0 : index
    %c0_22 = arith.constant 0 : index
    %c0_23 = arith.constant 0 : index
    %26 = vector.load %arg8[%c0_21, %c0_22, %c0_23] : memref<1x1x128xf32, #tpu.memory_space<vmem>>, vector<1x1x128xf32>
    %27 = vector.shape_cast %26 : vector<1x1x128xf32> to vector<1x128xf32>
    %28 = vector.broadcast %27 : vector<1x128xf32> to vector<8x128xf32>
    %29 = arith.addf %25, %28 : vector<8x128xf32>
    %30 = math.tanh %29 : vector<8x128xf32>
    %c0_24 = arith.constant 0 : index
    %c0_25 = arith.constant 0 : index
    %c0_26 = arith.constant 0 : index
    %31 = vector.load %arg9[%c0_24, %c0_25, %c0_26] : memref<1x8x128xf32, #tpu.memory_space<vmem>>, vector<1x8x128xf32>
    %32 = vector.shape_cast %31 : vector<1x8x128xf32> to vector<8x128xf32>
    %33 = vector.shape_cast %30 : vector<8x128xf32> to vector<1x8x128xf32>
    tpu.vector_store %arg9[%c0_24, %c0_25, %c0_26], %33 {strides = array<i32>} : memref<1x8x128xf32, #tpu.memory_space<vmem>>, vector<1x8x128xf32>,
    return
  }
  func.func @transform_0(%arg0: i32, %arg1: i32) -> (i32, i32, i32) {
    %c0_i32 = arith.constant 0 : i32
    %c0_i32_0 = arith.constant 0 : i32
    return %arg0, %arg1, %c0_i32 : i32, i32, i32
  }
  func.func @transform_1(%arg0: i32, %arg1: i32) -> (i32, i32, i32) {
    %c0_i32 = arith.constant 0 : i32
    %c0_i32_0 = arith.constant 0 : i32
    %c0_i32_1 = arith.constant 0 : i32
    return %arg0, %c0_i32, %c0_i32_0 : i32, i32, i32
  }
  func.func @transform_2(%arg0: i32, %arg1: i32) -> (i32, i32, i32) {
    %c0_i32 = arith.constant 0 : i32
    %c0_i32_0 = arith.constant 0 : i32
    %c0_i32_1 = arith.constant 0 : i32
    return %arg0, %c0_i32, %c0_i32_0 : i32, i32, i32
  }
  func.func @transform_3(%arg0: i32, %arg1: i32) -> (i32, i32, i32) {
    %c0_i32 = arith.constant 0 : i32
    %c0_i32_0 = arith.constant 0 : i32
    %c0_i32_1 = arith.constant 0 : i32
    return %arg0, %c0_i32, %c0_i32_0 : i32, i32, i32
  }
  func.func @transform_4(%arg0: i32, %arg1: i32) -> (i32, i32, i32) {
    %c0_i32 = arith.constant 0 : i32
    %c0_i32_0 = arith.constant 0 : i32
    %c0_i32_1 = arith.constant 0 : i32
    return %arg0, %c0_i32, %c0_i32_0 : i32, i32, i32
  }
  func.func @transform_5(%arg0: i32, %arg1: i32) -> (i32, i32, i32) {
    %c0_i32 = arith.constant 0 : i32
    %c0_i32_0 = arith.constant 0 : i32
    %c0_i32_1 = arith.constant 0 : i32
    return %arg0, %c0_i32, %c0_i32_0 : i32, i32, i32
  }
  func.func @transform_6(%arg0: i32, %arg1: i32) -> (i32, i32, i32) {
    %c0_i32 = arith.constant 0 : i32
    %c0_i32_0 = arith.constant 0 : i32
    %c0_i32_1 = arith.constant 0 : i32
    return %arg0, %c0_i32, %c0_i32_0 : i32, i32, i32
  }
  func.func @transform_7(%arg0: i32, %arg1: i32) -> (i32, i32, i32) {
    %c0_i32 = arith.constant 0 : i32
    %c0_i32_0 = arith.constant 0 : i32
    return %arg0, %arg1, %c0_i32 : i32, i32, i32
  }
}

</mosaic_0001>

<bundles_post_ra>
// kernel: tpu_custom_call.1
= control target key start
LH: loop header
LB: loop body
LE: loop exit
PB: predicated region body
PF: predicated region fallthrough
CT: control target
= control target key end

     0   :  { %s1685_s0 = inlined_call_operand.hbm [shape: f32[3,8,16], index: 0, kind: input, shape index: {}]   ;;  %s1686_s1 = inlined_call_operand.hbm [shape: bf16[3,16,128], index: 1, kind: input, shape index: {}]   ;;  %s1687_s2 = inlined_call_operand.vmem [shape: f32[3,1,128], index: 2, kind: input, shape index: {}]   ;;  %s1688_s3 = inlined_call_operand.hbm [shape: bf16[3,128,128], index: 3, kind: input, shape index: {}]   ;;  %s1689_s4 = inlined_call_operand.vmem [shape: f32[3,1,128], index: 4, kind: input, shape index: {}]   ;;  %s1690_s5 = inlined_call_operand.hbm [shape: bf16[3,128,128], index: 5, kind: input, shape index: {}]   ;;  %s1691_s6 = inlined_call_operand.vmem [shape: f32[3,1,128], index: 6, kind: input, shape index: {}]   ;;  %s1692_s7 = inlined_call_operand.hbm [shape: f32[3,8,128], index: 7, kind: output, shape index: {}]  }
   0x1   :  { %1702 = sst [smem:[#allocation20_spill]] %s1685_s0 }
   0x2   :  { %1703 = sst [smem:[#allocation21_spill]] %s1686_s1 }
   0x3   :  { %1704 = sst [smem:[#allocation22_spill]] %s1688_s3 }
   0x4   :  { %1705 = sst [smem:[#allocation23_spill]] %s1692_s7 }
   0x5   :  { %12 = vsyncpa [#allocation3], 0 }
   0x6   :  { %14 = vsyncpa [#allocation3 + $0x1], 0 }
   0x7   :  { %15 = vsyncpa [#allocation6], 0 }
   0x8   :  { %17 = vsyncpa [#allocation6 + $0x1], 0 }
   0x9   :  { %18 = vsyncpa [#allocation9], 0 }
   0xa   :  { %20 = vsyncpa [#allocation9 + $0x1], 0 }
   0xb   :  { %21 = vsyncpa [#allocation4], 0 }
   0xc   :  { %23 = vsyncpa [#allocation4 + $0x1], 0  ;;  %s1414_s24 = smov 0   ;;  %s1416_s25 = smov 0  }
   0xd   :  { %s1418_s26 = smov 0   ;;  %s1420_s27 = smov 0  }
   0xe   :  { %s1422_s28 = smov 0   ;;  %s1424_s29 = smov 0  }
   0xf LB: > { %1706 = sst [smem:[#allocation15_spill]] %s1343_s24  ;;  %s1445_s30 = sadd.s32 4294967295, %s1363_s29   ;;  %s1363_s29 = sphi %s1424_s29, %s29_s29   ;;  %s1359_s28 = sphi %s1422_s28, %s1732_s28   ;;  %s1355_s27 = sphi %s1420_s27, %s1731_s27   ;;  %s1351_s26 = sphi %s1418_s26, %s1727_s26   ;;  %s1347_s25 = sphi %s1416_s25, %s1730_s25   ;;  %s1343_s24 = sphi %s1414_s24, %s1729_s24  }
  0x10   : > { %1707 = sst [smem:[#allocation16_spill]] %s1351_s26  ;;  %s949_s8 = sadd.s32 4294967294, %s1363_s29  }
  0x11   : > { %s41_s9 = sadd.s32 1, %s1359_s28  ;;  %s50_s10 = sadd.s32 1, %s1351_s26 }
  0x12   : > { %p43_p0 = scmp.ge.s32.totalorder %s41_s9, 3  ;;  %p57_p1 = scmp.ne.s32.totalorder %s1351_s26, %s1347_s25 }
  0x13   : > { %p58_p2 = scmp.eq.s32.totalorder %s1363_s29, 0  ;;  %p63_p3 = scmp.ne.s32.totalorder %s1347_s25, %s1343_s24 }
  0x14   : > { %s1734_s9 = smov (%p43_p0, %s41_s9), 0  ;;  %p64_p5 = scmp.eq.s32.totalorder %s1445_s30, 0 }
  0x15   : > { %1708 = sst [smem:[#allocation17_spill]] %s1734_s9  ;;  %p1457_p4 = por %p58_p2, %p57_p1 }
  0x16   : > { %s45_s12 = ssub.s32 %s1359_s28, %s1734_s9  ;;  %p245_p6 = scmp.eq.s32.totalorder %s1445_s30, 2 }
  0x17   : > { %p48_p7 = scmp.eq.s32.totalorder %s45_s12, 0  ;;  %p1465_p8 = por %p64_p5, %p63_p3 }
  0x18   : > { %p1469_p9 = por %p245_p6, %p57_p1  ;;  %p251_p10 = scmp.eq.s32.totalorder %s949_s8, 2 }
  0x19   : > { %s1474_s15 = scalar_select %p48_p7, %s1351_s26, %s50_s10  }
  0x1a   : > { %p1476_p11 = por %p251_p10, %p63_p3  ;;  %p1090_p12 = scmp.lt.s32.totalorder %s1363_s29, 3 }
  0x1b   : > { %1712 = sst [smem:[#allocation18_spill]] %s1474_s15  ;;  %s1482_s17 = sand.u32 1, %s1351_s26  }
  0x1c   : > { %s1713_s16 = scalar_select %p1476_p11, 1, 0 }
  0x1d   : > { %s952_s18 = sshll.u32 %s1482_s17, 3  ;;  %s953_s19 = sshll.u32 %s1359_s28, 7 }
  0x1e   : > { %1714 = sst [smem:[#allocation19_spill]] %s1713_s16  ;;  %p1488_p13 = pnand %p1090_p12, %p1457_p4 }
  0x1f   : > { %s290_s21 = sand.u32 1, %s1363_s29   ;;  %s1716_s1 = sld [smem:[#allocation21_spill]] }
  0x20   : > { %s294_s10 = scalar_lea.vmem [#allocation5], %s952_s18  ;;  %s1500_s9 = scalar_lea.sflag [#allocation6], %s290_s21 }
  0x21   : > { %s301_s12 = sshll.u32 %s294_s10, 4  ;;  %p1165_p0 = pneg %p1488_p13  ;;  %s302_s12 = int_to_ptr.vmem [resolvable:$true] %s301_s12 }
  0x22   : > { %s1176_s11 = scalar_lea.vmem %s302_s12, 128  ;;  %s1365_s15 = smov [#allocation5]  }
  0x23   : > { %p1177_p1 = scmp.ne.s32.totalorder %s302_s12, %s1176_s11  ;;  %s1181_s26 = sshll.u32 %s1365_s15, 4  ;;  %s1182_s26 = int_to_ptr.vmem [resolvable:$false] %s1181_s26 }
  0x24   : > { %s1183_s16 = scalar_lea.vmem %s1182_s26, 256  ;;  %p1184_p4 = scmp.lt.s32.totalorder %s302_s12, %s1182_s26 }
  0x25   : > { %s300_s8 = scalar_lea.hbm %s1716_s1, %s953_s19  ;;  %p1179_p2 = pnand %p1177_p1, %p1165_p0 }
  0x26   : > { %p1185_p5 = scmp.lt.s32.totalorder %s1183_s16, %s1176_s11 }
  0x27   : > { %p1180_p3 = pneg %p1179_p2 }
  0x28   : > { %p1186_p6 = por %p1185_p5, %p1184_p4 }
  0x2a   : > { %p1187_p7 = pnand %p1186_p6, %p1180_p3 }
  0x2c   : > { %1190 = shalt.err (!%p1187_p7)
}
  0x2d   : > { %s1698_s22 = smov 64   ;;  %s1700_s21 = smov 4  }
  0x2e   : > { %1079 = dma.hbm_to_vmem [thread:$0]  (!%p1488_p13), %s300_s8, 128, %s302_s12, %s1500_s9, %s1698_s22, %s1698_s22, %s1700_s21  }
  0x2f   : > { %p963_p10 = scmp.ge.s32.totalorder %s1363_s29, 1  ;;  %p369_p12 = scmp.lt.s32.totalorder %s1363_s29, 4 }
  0x30   : > { %s1718_s0 = sld [smem:[#allocation20_spill]]  ;;  %s275_s10 = scalar_lea.vmem [#allocation2], %s952_s18 }
  0x31   : > { %p1515_p1 = pnand %p963_p10, %p369_p12  ;;  %s283_s11 = sshll.u32 %s275_s10, 4  ;;  %s284_s11 = int_to_ptr.vmem [resolvable:$true] %s283_s11 }
  0x32   : > { %s957_s1 = sshll.u32 %s1482_s17, 6  ;;  %s272_s24 = scalar_lea.sflag [#allocation3], %s1482_s17 }
  0x33   : > { %s1204_s7 = scalar_lea.vmem %s284_s11, 128  ;;  %s1368_s8 = smov [#allocation2]  }
  0x34   : > { %p1205_p2 = scmp.ne.s32.totalorder %s284_s11, %s1204_s7  ;;  %s1209_s12 = sshll.u32 %s1368_s8, 4  ;;  %s1210_s12 = int_to_ptr.vmem [resolvable:$false] %s1209_s12 }
  0x35   : > { %s1211_s22 = scalar_lea.vmem %s1210_s12, 256  ;;  %p1212_p5 = scmp.lt.s32.totalorder %s284_s11, %s1210_s12 }
  0x36   : > { %s281_s23 = scalar_lea.hbm %s1718_s0, %s953_s19  ;;  %p1207_p3 = pnand %p1205_p2, %p1165_p0 }
  0x37   : > { %p1213_p6 = scmp.lt.s32.totalorder %s1211_s22, %s1204_s7 }
  0x38   : > { %p1208_p4 = pneg %p1207_p3 }
  0x39   : > { %p1214_p7 = por %p1213_p6, %p1212_p5 }
  0x3b   : > { %p1215_p10 = pnand %p1214_p7, %p1208_p4 }
  0x3d   : > { %1218 = shalt.err (!%p1215_p10)
}
  0x3e   : > { %1076 = dma.hbm_to_vmem [thread:$0]  (!%p1488_p13), %s281_s23, 128, %s284_s11, %s272_s24  }
  0x3f   : > { %s995_s18 = sshll.u32 %s1359_s28, 10  ;;  %s321_s19 = scalar_lea.vmem [#allocation7], %s957_s1 }
  0x40   : > { %s328_s15 = sshll.u32 %s321_s19, 4  ;;  %s1719_s3 = sld [smem:[#allocation22_spill]]  ;;  %s329_s15 = int_to_ptr.vmem [resolvable:$true] %s328_s15 }
  0x41   : > { %s1232_s12 = scalar_lea.vmem %s329_s15, 1024  ;;  %s1369_s7 = smov [#allocation7]  }
  0x42   : > { %p1233_p12 = scmp.ne.s32.totalorder %s329_s15, %s1232_s12  ;;  %s1237_s22 = sshll.u32 %s1369_s7, 4  ;;  %s1238_s22 = int_to_ptr.vmem [resolvable:$false] %s1237_s22 }
  0x43   : > { %s1239_s21 = scalar_lea.vmem %s1238_s22, 2048  ;;  %p1240_p4 = scmp.lt.s32.totalorder %s329_s15, %s1238_s22 }
  0x44   : > { %p1235_p2 = pnand %p1233_p12, %p1165_p0  ;;  %p1241_p5 = scmp.lt.s32.totalorder %s1239_s21, %s1232_s12 }
  0x46   : > { %s327_s8 = scalar_lea.hbm %s1719_s3, %s995_s18  ;;  %p1236_p3 = pneg %p1235_p2 }
  0x47   : > { %p1242_p6 = por %p1241_p5, %p1240_p4 }
  0x49   : > { %p1243_p7 = pnand %p1242_p6, %p1236_p3 }
  0x4b   : > { %1246 = shalt.err (!%p1243_p7)
}
  0x4c   : > { %s1720_s24 = smov 4   ;;  %s1721_s23 = smov 64  }
  0x4d   : > { %1082 = dma.hbm_to_vmem [thread:$0]  (!%p1488_p13), %s327_s8, 1024, %s329_s15, %s1500_s9, %s1721_s23, %s1721_s23, %s1720_s24  }
  0x4e   : > { %s354_s16 = scalar_lea.hbm %s1690_s5, %s995_s18  ;;  %s348_s10 = scalar_lea.vmem [#allocation8], %s957_s1 }
  0x4f   : > { %s355_s21 = sshll.u32 %s348_s10, 4  ;;  %s345_s12 = scalar_lea.sflag [#allocation9], %s1482_s17  ;;  %s356_s21 = int_to_ptr.vmem [resolvable:$true] %s355_s21 }
  0x50   : > { %s1260_s7 = scalar_lea.vmem %s356_s21, 1024  ;;  %s1370_s22 = smov [#allocation8]  }
  0x51   : > { %p1261_p10 = scmp.ne.s32.totalorder %s356_s21, %s1260_s7  ;;  %s1265_s0 = sshll.u32 %s1370_s22, 4  ;;  %s1266_s0 = int_to_ptr.vmem [resolvable:$false] %s1265_s0 }
  0x52   : > { %s1267_s3 = scalar_lea.vmem %s1266_s0, 2048  ;;  %p1268_p3 = scmp.lt.s32.totalorder %s356_s21, %s1266_s0 }
  0x53   : > { %p1263_p12 = pnand %p1261_p10, %p1165_p0  ;;  %p1269_p4 = scmp.lt.s32.totalorder %s1267_s3, %s1260_s7 }
  0x55   : > { %p1264_p2 = pneg %p1263_p12  ;;  %p1270_p5 = por %p1269_p4, %p1268_p3 }
  0x57   : > { %p1271_p6 = pnand %p1270_p5, %p1264_p2 }
  0x59   : > { %1274 = shalt.err (!%p1271_p6)
}
  0x5a   : > { %1085 = dma.hbm_to_vmem [thread:$0]  (!%p1488_p13), %s354_s16, 1024, %s356_s21, %s345_s12, %s1721_s23, %s1721_s23, %s1720_s24  }
  0x5b   : > { %373 = sbr.rel (%p1515_p1) target bundleno = 729 (0x2d9), region = 48  ;;  %s1565_s1 = sand.u32 (!%p1515_p1), 1, %s1347_s25  }
  0x5c   : > { %s1568_s0 = sshll.u32 (!%p1515_p1), %s1565_s1, 3  ;;  %s376_s3 = scalar_lea.sflag (!%p1515_p1), [#allocation3], %s1565_s1 }
  0x5d   : > { %s379_s9 = scalar_lea.vmem (!%p1515_p1), [#allocation2], %s1568_s0 }
  0x60   : > { %1326 = dma.done.wait (%p1465_p8), %s376_s3, 128  }
  0x61   : > { %1328 = vsyncadd (%p1465_p8), %s376_s3, 4294967168  ;;  %s384_s17 = sand.u32 1, %s1445_s30   ;;  %s388_s26 = scalar_lea.vmem [#allocation5], %s1568_s0 }
  0x62   : > { %s385_s20 = scalar_lea.sflag [#allocation6], %s384_s17 }
  0x63   : > { %1330 = dma.done.wait (%p1465_p8), %s385_s20, 1152  }
  0x64   : > { %1332 = vsyncadd (%p1465_p8), %s385_s20, 4294966144  ;;  %s966_s18 = sshll.u32 %s1565_s1, 6  ;;  %s403_s8 = scalar_lea.sflag [#allocation9], %s1565_s1 }
  0x65   : > { %s1583_s15 = scalar_lea.vmem [#allocation7], %s966_s18  ;;  %s1586_s24 = scalar_lea.vmem [#allocation8], %s966_s18 }
  0x66   : > { %1334 = dma.done.wait (%p1465_p8), %s403_s8, 1024  }
  0x67   : > { %1336 = vsyncadd (%p1465_p8), %s403_s8, 4294966272  ;;  %v1371_v0 = vmov 0.0   ;;  %vm1372_vm0 = vmmov 0   ;;  %v1144_v1 = vld [vmem:[%s388_s26] sm:$0xff]   ;;  %v471_v2 = vld [vmem:[%s379_s9] sm:$0xff]  ;;  %vm488_vm1 = vcmask 130048  }
  0x68   : > { %1017 = vmatprep.subr.bf16.mxu0 %v1371_v0  ;;  %1019 = vmatprep.mubr.msk.bf16.mxu0 %vm1372_vm0, %v1371_v0  ;;  %v472_v3 = vpack.c.bf16 %v471_v2, %v471_v2  ;;  %v1145_v4 = vld [vmem:[%s1583_s15 + $0x38] sm:$0xff]   ;;  %v1146_v5 = vld [vmem:[%s1583_s15 + $0x30] sm:$0xff]   ;;  %v1147_v6 = vld [vmem:[%s1583_s15 + $0x28] sm:$0xff]   ;;  %p461_p8 = scmp.lt.s32.totalorder %s1355_s27, 2  ;;  %s991_s22 = sshll.u32 %s1355_s27, 7 }
  0x69   : > { %1023 = vmatprep.subr.bf16.mxu1 %v1371_v0  ;;  %1039 = vmatprep.mubr.msk.bf16.mxu1 %vm1372_vm0, %v1371_v0  ;;  %v1148_v7 = vld [vmem:[%s1583_s15 + $0x20] sm:$0xff]   ;;  %v1149_v8 = vld [vmem:[%s1583_s15 + $0x18] sm:$0xff]   ;;  %v1150_v9 = vld [vmem:[%s1583_s15 + $0x10] sm:$0xff]   ;;  %s460_s3 = scalar_lea.vmem [#allocation10], %s1568_s0  ;;  %s1722_s26 = sld [smem:[#allocation23_spill]] }
  0x6a   : > { %1018 = vmatpush3.bf16.msra.mxu0 %v1144_v1  ;;  %1024 = vmatpush3.bf16.msra.mxu1 %v1145_v4  ;;  %v1151_v10 = vld [vmem:[%s1583_s15 + $0x8] sm:$0xff]   ;;  %v1152_v11 = vld [vmem:[%s1583_s15] sm:$0xff]   ;;  %v1153_v12 = vld [vmem:[%s1586_s24 + $0x38] sm:$0xff]   ;;  %s462_s30 = scalar_select %p461_p8, %s1355_s27, 2 }
  0x6b   : > { %1043 = vmatprep.subr.bf16.mxu0 %v1371_v0  ;;  %1025 = vmatprep.subr.bf16.mxu1 %v1371_v0  ;;  %v1154_v13 = vld [vmem:[%s1586_s24 + $0x30] sm:$0xff]   ;;  %v1155_v14 = vld [vmem:[%s1586_s24 + $0x28] sm:$0xff]   ;;  %v1156_v15 = vld [vmem:[%s1586_s24 + $0x20] sm:$0xff]   ;;  %s775_s9 = sshll.u32 %s460_s3, 4  ;;  %s761_s8 = scalar_lea.sflag [#allocation4], %s1565_s1  ;;  %s776_s9 = int_to_ptr.vmem [resolvable:$true] %s775_s9 }
  0x6c   : > { %v1157_v16 = vld [vmem:[%s1586_s24 + $0x18] sm:$0xff]   ;;  %v1158_v17 = vld [vmem:[%s1586_s24 + $0x10] sm:$0xff]   ;;  %s463_s11 = scalar_lea.vmem %s1687_s2, %s462_s30  ;;  %v1159_v26 = vld [vmem:[%s1586_s24 + $0x8] sm:$0xff]   ;;  %s466_s10 = scalar_lea.vmem %s1689_s4, %s462_s30 }
  0x6d   : > { %1020 = vmatmul.mubr.msk.bf16.vlgmr.msra.gmra.mxu0 %vm488_vm1, %v472_v3  ;;  %v969_v18 = vld [vmem:[%s463_s11] ss:$0 sm:$0xff]  ;;  %s469_s7 = scalar_lea.vmem %s1691_s6, %s462_s30  ;;  %s1373_s30 = smov [#allocation10]  }
  0x6e   : > { %1059 = vmatprep.mubr.msk.bf16.mxu0 %vm1372_vm0, %v1371_v0  ;;  %1026 = vmatpush3.bf16.msra.mxu1 %v1146_v5  ;;  %v1160_v27 = vld [vmem:[%s1586_s24] sm:$0xff]   ;;  %s1275_s24 = scalar_lea.vmem %s776_s9, 128  ;;  %s1279_s13 = sshll.u32 %s1373_s30, 4  ;;  %s1280_s13 = int_to_ptr.vmem [resolvable:$false] %s1279_s13 }
  0x6f   : > { %1027 = vmatprep.subr.bf16.mxu1 %v1371_v0  ;;  %1044 = vmatpush3.bf16.msra.mxu0 %v1153_v12  ;;  %v972_v28 = vld [vmem:[%s466_s10] ss:$0 sm:$0xff]  ;;  %s1723_s18 = smov %s1722_s26  ;;  %s1644_s15 = scalar_lea.hbm %s1722_s26, %s991_s22 }
  0x70   : > { %1045 = vmatprep.subr.bf16.mxu0 %v1371_v0  ;;  %v981_v36 = vld [vmem:[%s469_s7] ss:$0 sm:$0xff]  ;;  %p1276_p13 = scmp.ne.s32.totalorder %s776_s9, %s1275_s24  ;;  %s1281_s27 = scalar_lea.vmem %s1280_s13, 256 }
  0x71   : > { %p1282_p7 = scmp.lt.s32.totalorder %s776_s9, %s1280_s13  ;;  %p1283_p10 = scmp.lt.s32.totalorder %s1281_s27, %s1275_s24 }
  0x72   : > { %1028 = vmatpush3.bf16.msra.mxu1 %v1147_v6  ;;  %p1277_p0 = pnand %p1276_p13, %p1469_p9 }
  0x73   : > { %1029 = vmatprep.subr.bf16.mxu1 %v1371_v0  ;;  %1046 = vmatpush3.bf16.msra.mxu0 %v1154_v13  ;;  %p1284_p12 = por %p1283_p10, %p1282_p7 }
  0x74   : > { %1047 = vmatprep.subr.bf16.mxu0 %v1371_v0  ;;  %p1278_p1 = pneg %p1277_p0 }
  0x76   : > { %1030 = vmatpush3.bf16.msra.mxu1 %v1148_v7  ;;  %p1285_p2 = pnand %p1284_p12, %p1278_p1 }
  0x77   : > { %1031 = vmatprep.subr.bf16.mxu1 %v1371_v0  ;;  %1048 = vmatpush3.bf16.msra.mxu0 %v1155_v14 }
  0x78   : > { %1049 = vmatprep.subr.bf16.mxu0 %v1371_v0 }
  0x7a   : > { %1032 = vmatpush3.bf16.msra.mxu1 %v1149_v8 }
  0x7b   : > { %1033 = vmatprep.subr.bf16.mxu1 %v1371_v0  ;;  %1050 = vmatpush3.bf16.msra.mxu0 %v1156_v15 }
  0x7c   : > { %1051 = vmatprep.subr.bf16.mxu0 %v1371_v0 }
  0x7e   : > { %1034 = vmatpush3.bf16.msra.mxu1 %v1150_v9 }
  0x7f   : > { %1035 = vmatprep.subr.bf16.mxu1 %v1371_v0  ;;  %1052 = vmatpush3.bf16.msra.mxu0 %v1157_v16 }
  0x80   : > { %1053 = vmatprep.subr.bf16.mxu0 %v1371_v0 }
  0x82   : > { %1036 = vmatpush3.bf16.msra.mxu1 %v1151_v10 }
  0x83   : > { %1037 = vmatprep.subr.bf16.mxu1 %v1371_v0  ;;  %1054 = vmatpush3.bf16.msra.mxu0 %v1158_v17 }
  0x84   : > { %1055 = vmatprep.subr.bf16.mxu0 %v1371_v0 }
  0x86   : > { %1038 = vmatpush3.bf16.msra.mxu1 %v1152_v11 }
  0x87   : > { %1056 = vmatpush3.bf16.msra.mxu0 %v1159_v26 }
  0x88   : > { %1057 = vmatprep.subr.bf16.mxu0 %v1371_v0 }
  0x8b   : > { %1058 = vmatpush3.bf16.msra.mxu0 %v1160_v27 }
 0x12d   : > { %v526_v19 = vpop.f32.mrf.mxu0 }
 0x12e   : > { %v527_v20 = vadd.f32 %v969_v18, %v526_v19 }
 0x12f   : > { %v1021_v21 = vpop.f32.mrf.mxu0 }
 0x130   : > { %v532_v22 = vmax.f32 %v527_v20, 0.0 }
 0x131   : > { %v529_v23 = vpop.f32.mrf.mxu0 }
 0x132   : > { %v533_v24 = vpack.c.bf16 %v532_v22, %v532_v22 }
 0x133   : > { %v1022_v25 = vpop.f32.mrf.mxu0 }
 0x134   : > { %1040 = vmatmul.mubr.bf16.vlgmr.msra.gmra.mxu1 %v533_v24 }
 0x1f4   : > { %v639_v29 = vpop.f32.mrf.mxu1 }
 0x1f5   : > { %v640_v30 = vadd.f32 %v972_v28, %v639_v29 }
 0x1f6   : > { %v1041_v31 = vpop.f32.mrf.mxu1 }
 0x1f7   : > { %v645_v32 = vmax.f32 %v640_v30, 0.0 }
 0x1f8   : > { %v642_v33 = vpop.f32.mrf.mxu1 }
 0x1f9   : > { %v646_v34 = vpack.c.bf16 %v645_v32, %v645_v32 }
 0x1fa   : > { %v1042_v35 = vpop.f32.mrf.mxu1 }
 0x1fb   : > { %1060 = vmatmul.mubr.bf16.vlgmr.msra.gmra.mxu0 %v646_v34 }
 0x2bb   : > { %v752_v37 = vpop.f32.mrf.mxu0 }
 0x2bc   : > { %v753_v38 = vadd.f32 %v981_v36, %v752_v37 }
 0x2bd   : > { %v1061_v39 = vpop.f32.mrf.mxu0 }
 0x2be   : > { %1161 = vtanh.f32 %v753_v38 }
 0x2bf   : > { %v755_v40 = vpop.f32.mrf.mxu0 }
 0x2c1   : > { %v1062_v41 = vpop.f32.mrf.mxu0 }
 0x2cb   : > { %v1162_v42 = vpop.eup %1161 }
 0x2cc   : > { %759 = vst [vmem:[%s460_s3] sm:$0xff] %v1162_v42 }
 0x2cd   : > { %1288 = shalt.err (!%p1285_p2)
}
 0x2ce   : > { %s1289_s0 = scalar_lea.hbm %s1644_s15, 128  ;;  %s1293_s11 = scalar_lea.hbm %s1723_s18, 384 }
 0x2cf   : > { %p1290_p3 = scmp.ne.s32.totalorder %s1644_s15, %s1289_s0  ;;  %p1294_p6 = scmp.lt.s32.totalorder %s1644_s15, %s1723_s18 }
 0x2d0   : > { %p1295_p8 = scmp.lt.s32.totalorder %s1293_s11, %s1289_s0 }
 0x2d1   : > { %p1291_p4 = pnand %p1290_p3, %p1469_p9 }
 0x2d2   : > { %p1296_p13 = por %p1295_p8, %p1294_p6 }
 0x2d3   : > { %p1292_p5 = pneg %p1291_p4 }
 0x2d5   : > { %p1297_p0 = pnand %p1296_p13, %p1292_p5 }
 0x2d7   : > { %1300 = shalt.err (!%p1297_p0)
}
 0x2d8   : > { %1071 = dma.vmem_to_hbm [thread:$0]  (%p1469_p9), %s776_s9, 128, %s1644_s15, %s761_s8  }
 0x2d9 PF: > { %s1724_s10 = sld [smem:[#allocation15_spill]]  ;;  %p1091_p1 = scmp.ge.s32.totalorder %s1363_s29, 2 }
 0x2db   : > { %p1087_p7 = pnand %p1091_p1, %p1476_p11 }
 0x2dd   : > { %p1088_p10 = pneg %p1087_p7 }
 0x2df   : > { %s787_s12 = sand.u32 1, %s1724_s10  }
 0x2e0   : > { %s788_s7 = scalar_lea.sflag [#allocation4], %s787_s12 }
 0x2e1   : > { %1338 = dma.done.wait (%p1088_p10), %s788_s7, 128  }
 0x2e2   : > { %1340 = vsyncadd (%p1088_p10), %s788_s7, 4294967168  ;;  %s29_s29 = sadd.s32 1, %s1363_s29   ;;  %s1726_s22 = sld [smem:[#allocation16_spill]] }
 0x2e3   : > { %p26_p12 = scmp.ge.s32.totalorder %s29_s29, 5   ;;  %s1727_s26 = sld [smem:[#allocation18_spill]] }
 0x2e4   : > { %s1728_s14 = sld [smem:[#allocation17_spill]]  ;;  %s1729_s24 = smov %s1347_s25 }
 0x2e5   : > { %s1731_s27 = smov %s1359_s28 }
 0x2e6   :  { %28 = sbr.rel (!%p26_p12) target bundleno = 15 (0xf), region = 139 }
 0x2e8   : > { %s1730_s25 = smov %s1726_s22 }
 0x2ea   : > { %s1732_s28 = smov %s1728_s14 }
 0x2eb   :  { %793 = vsyncpa [#allocation3], 1 }
 0x2ec   :  { %795 = vsyncpa [#allocation3 + $0x1], 1 }
 0x2ed   :  { %796 = vsyncpa [#allocation6], 1 }
 0x2ee   :  { %798 = vsyncpa [#allocation6 + $0x1], 1 }
 0x2ef   :  { %799 = vsyncpa [#allocation9], 1 }
 0x2f0   :  { %801 = vsyncpa [#allocation9 + $0x1], 1 }
 0x2f1   :  { %802 = vsyncpa [#allocation4], 1 }
 0x2f2   :  { %804 = vsyncpa [#allocation4 + $0x1], 1 }

</bundles_post_ra>
